<compile_context>
chip_gen: v7x
topology: tpu7x:2x2x1
jax: 0.10.0
libtpu: 0.0.40
codegen_flags: <defaults>
</compile_context>

<pallas_src>
import math
from functools import partial

import jax
import jax.numpy as jnp
import numpy as np
from jax.experimental import pallas as pl
from jax.experimental.pallas import tpu as pltpu

_LANES = 128            # vreg lane width
_SUBLANES = 8           # f32 sublane tile
_MAX_BLOCK_ROWS = 512   # (512, 128) f32 = 256 KiB / buffer


def _round_up(v, m):
    return ((v + m - 1) // m) * m


def _binom_logpmf_table(n, p):
    """Binomial(n, p) log-pmf for k = 0..n, computed in float64 at trace time."""
    n = int(n)
    if p <= 0.0:
        return tuple(0.0 if k == 0 else -math.inf for k in range(n + 1))
    if p >= 1.0:
        return tuple(0.0 if k == n else -math.inf for k in range(n + 1))
    lg_n1 = math.lgamma(n + 1.0)
    log_p, log_1mp = math.log(p), math.log1p(-p)
    return tuple(
        lg_n1 - math.lgamma(k + 1.0) - math.lgamma(n - k + 1.0)
        + k * log_p + (n - k) * log_1mp
        for k in range(n + 1)
    )


def _make_simple_bin_kernel(tbl_x, tbl_y):
    """Bakes the two static log-pmf tables into a VPU select-chain kernel body."""
    tbl_x = tuple(float(v) for v in tbl_x)
    tbl_y = tuple(float(v) for v in tbl_y)

    def kernel(kx_ref, ky_ref, o_ref):
        # kx_ref / ky_ref / o_ref: (block_rows, 128) f32 — fully dense vregs.
        kx = kx_ref[...]
        ky = ky_ref[...]
        lp_x = jnp.full_like(kx, tbl_x[0])
        for k in range(1, len(tbl_x)):          # unrolled: O(ss_dim) cmp+select
            lp_x = jnp.where(kx == float(k), tbl_x[k], lp_x)
        lp_y = jnp.full_like(ky, tbl_y[0])
        for k in range(1, len(tbl_y)):
            lp_y = jnp.where(ky == float(k), tbl_y[k], lp_y)
        o_ref[...] = lp_x + lp_y

    return kernel


@partial(jax.jit, static_argnames=("ss_dim", "mean"))
def simple_bin_forward(x, *, ss_dim, mean):
    """x: (B, 2) float counts (integers in [0, ss_dim]). Returns (B,) f32.

    Note: the select chain unrolls O(ss_dim) ops — the right trade for the
    small ss_dim regime this module targets (tens).
    """
    n = int(ss_dim)
    p_x = float(mean[0]) / float(ss_dim)
    p_y = float(mean[1]) / float(ss_dim)
    tbl_x = _binom_logpmf_table(n, p_x)
    tbl_y = _binom_logpmf_table(n, p_y)

    B = x.shape[0]
    rows = -(-B // _LANES)                      # ceil(B / 128)
    if rows <= _SUBLANES:
        block_rows = _SUBLANES
    else:
        # >= 2 grid steps when there is enough work (keeps both v7x TCs busy),
        # capped so each buffer is <= 256 KiB and double-buffers trivially.
        block_rows = min(_MAX_BLOCK_ROWS, _round_up(-(-rows // 2), _SUBLANES))
    rows_pad = _round_up(rows, block_rows)
    num_blocks = rows_pad // block_rows
    B_pad = rows_pad * _LANES

    # Dense layout plumbing: one (rows_pad, 128) slab per feature, zero-padded
    # (padding selects tbl[0] -> finite; padded lanes are sliced off below).
    xf = x.astype(jnp.float32)
    kx = jnp.zeros((B_pad,), jnp.float32).at[:B].set(xf[:, 0]).reshape(rows_pad, _LANES)
    ky = jnp.zeros((B_pad,), jnp.float32).at[:B].set(xf[:, 1]).reshape(rows_pad, _LANES)

    kernel = _make_simple_bin_kernel(tbl_x, tbl_y)

    elems = rows_pad * _LANES
    cost = pl.CostEstimate(
        flops=(4 * n + 3) * elems,          # 2 features * n * (cmp + select) + final add
        transcendentals=0,                  # lgamma/log all folded into the static tables
        bytes_accessed=3 * 4 * elems,       # 2 f32 inputs + 1 f32 output
    )

    out = pl.pallas_call(
        kernel,
        out_shape=jax.ShapeDtypeStruct((rows_pad, _LANES), jnp.float32),
        grid=(num_blocks,),
        in_specs=[pl.BlockSpec((block_rows, _LANES), lambda i: (i, 0)),
                  pl.BlockSpec((block_rows, _LANES), lambda i: (i, 0))],
        out_specs=pl.BlockSpec((block_rows, _LANES), lambda i: (i, 0)),
        compiler_params=pltpu.CompilerParams(dimension_semantics=("parallel",)),
        cost_estimate=cost,
    )(kx, ky)

    return out.reshape(-1)[:B]


def _reference(x_np, ss_dim, mean):
    n = float(ss_dim)
    p_x = mean[0] / n
    p_y = mean[1] / n

    def logpmf(k, p):
        return (math.lgamma(n + 1.0)
                - np.vectorize(math.lgamma)(k + 1.0)
                - np.vectorize(math.lgamma)(n - k + 1.0)
                + k * math.log(p) + (n - k) * math.log1p(-p))

    return logpmf(x_np[:, 0], p_x) + logpmf(x_np[:, 1], p_y)


if __name__ == "__main__":
    # Deterministic module parameters.
    SS_DIM = 16
    MEAN = (6.0, 10.0)

    # Deterministic inputs: integer counts in [0, ss_dim], shape (B, 2).
    key = jax.random.PRNGKey(0)
    B = 8
    x = jax.random.randint(key, (B, 2), 0, SS_DIM + 1).astype(jnp.float32)

    out = simple_bin_forward(x, ss_dim=SS_DIM, mean=MEAN)
    out = jax.block_until_ready(out)

    ref = _reference(np.asarray(x, dtype=np.float64), SS_DIM, MEAN)
    np.testing.assert_allclose(np.asarray(out, dtype=np.float64), ref, rtol=1e-5, atol=1e-6)

    print("KERNEL_OK")
</pallas_src>

<mosaic_0001>
module attributes {stable_mosaic.version = 11 : i64} {
  func.func @kernel(%arg0: i32, %arg1: memref<8x128xf32, #tpu.memory_space<vmem>>, %arg2: memref<8x128xf32, #tpu.memory_space<vmem>>, %arg3: memref<8x128xf32, #tpu.memory_space<vmem>>) attributes {dimension_semantics = [#tpu.dimension_semantics<parallel>], iteration_bounds = array<i64: 1>, scalar_prefetch = 0 : i64, scratch_operands = 0 : i64, tpu.core_type = #tpu.core_type<tc>, window_params = [{transform_indices = @transform_0, window_bounds = array<i64: 8, 128>}, {transform_indices = @transform_1, window_bounds = array<i64: 8, 128>}, {transform_indices = @transform_2, window_bounds = array<i64: 8, 128>}]} {
    %c0 = arith.constant 0 : index
    %c0_0 = arith.constant 0 : index
    %0 = vector.load %arg1[%c0, %c0_0] : memref<8x128xf32, #tpu.memory_space<vmem>>, vector<8x128xf32>
    %c0_1 = arith.constant 0 : index
    %c0_2 = arith.constant 0 : index
    %1 = vector.load %arg2[%c0_1, %c0_2] : memref<8x128xf32, #tpu.memory_space<vmem>>, vector<8x128xf32>
    %cst = arith.constant -7.52005816 : f32
    %2 = vector.broadcast %cst : f32 to vector<8x128xf32>
    %cst_3 = arith.constant 1.000000e+00 : f32
    %3 = vector.broadcast %cst_3 : f32 to vector<8x128xf32>
    %4 = arith.cmpf oeq, %0, %3 : vector<8x128xf32>
    %cst_4 = arith.constant -5.25829506 : f32
    %5 = vector.broadcast %cst_4 : f32 to vector<8x128xf32>
    %6 = arith.select %4, %5, %2 : vector<8x128xi1>, vector<8x128xf32>
    %cst_5 = arith.constant 2.000000e+00 : f32
    %7 = vector.broadcast %cst_5 : f32 to vector<8x128xf32>
    %8 = arith.cmpf oeq, %0, %7 : vector<8x128xf32>
    %cst_6 = arith.constant -3.75421762 : f32
    %9 = vector.broadcast %cst_6 : f32 to vector<8x128xf32>
    %10 = arith.select %8, %9, %6 : vector<8x128xi1>, vector<8x128xf32>
    %cst_7 = arith.constant 3.000000e+00 : f32
    %11 = vector.broadcast %cst_7 : f32 to vector<8x128xf32>
    %12 = arith.cmpf oeq, %0, %11 : vector<8x128xf32>
    %cst_8 = arith.constant -2.72459817 : f32
    %13 = vector.broadcast %cst_8 : f32 to vector<8x128xf32>
    %14 = arith.select %12, %13, %10 : vector<8x128xi1>, vector<8x128xf32>
    %cst_9 = arith.constant 4.000000e+00 : f32
    %15 = vector.broadcast %cst_9 : f32 to vector<8x128xf32>
    %16 = arith.cmpf oeq, %0, %15 : vector<8x128xf32>
    %cst_10 = arith.constant -2.05676889 : f32
    %17 = vector.broadcast %cst_10 : f32 to vector<8x128xf32>
    %18 = arith.select %16, %17, %14 : vector<8x128xi1>, vector<8x128xf32>
    %cst_11 = arith.constant 5.000000e+00 : f32
    %19 = vector.broadcast %cst_11 : f32 to vector<8x128xf32>
    %20 = arith.cmpf oeq, %0, %19 : vector<8x128xf32>
    %cst_12 = arith.constant -1.69212568 : f32
    %21 = vector.broadcast %cst_12 : f32 to vector<8x128xf32>
    %22 = arith.select %20, %21, %18 : vector<8x128xi1>, vector<8x128xf32>
    %cst_13 = arith.constant 6.000000e+00 : f32
    %23 = vector.broadcast %cst_13 : f32 to vector<8x128xf32>
    %24 = arith.cmpf oeq, %0, %23 : vector<8x128xf32>
    %cst_14 = arith.constant -1.59681547 : f32
    %25 = vector.broadcast %cst_14 : f32 to vector<8x128xf32>
    %26 = arith.select %24, %25, %22 : vector<8x128xi1>, vector<8x128xf32>
    %cst_15 = arith.constant 7.000000e+00 : f32
    %27 = vector.broadcast %cst_15 : f32 to vector<8x128xf32>
    %28 = arith.cmpf oeq, %0, %27 : vector<8x128xf32>
    %cst_16 = arith.constant -1.75096619 : f32
    %29 = vector.broadcast %cst_16 : f32 to vector<8x128xf32>
    %30 = arith.select %28, %29, %26 : vector<8x128xi1>, vector<8x128xf32>
    %cst_17 = arith.constant 8.000000e+00 : f32
    %31 = vector.broadcast %cst_17 : f32 to vector<8x128xf32>
    %32 = arith.cmpf oeq, %0, %31 : vector<8x128xf32>
    %cst_18 = arith.constant -2.14400887 : f32
    %33 = vector.broadcast %cst_18 : f32 to vector<8x128xf32>
    %34 = arith.select %32, %33, %30 : vector<8x128xi1>, vector<8x128xf32>
    %cst_19 = arith.constant 9.000000e+00 : f32
    %35 = vector.broadcast %cst_19 : f32 to vector<8x128xf32>
    %36 = arith.cmpf oeq, %0, %35 : vector<8x128xf32>
    %cst_20 = arith.constant -2.77261734 : f32
    %37 = vector.broadcast %cst_20 : f32 to vector<8x128xf32>
    %38 = arith.select %36, %37, %34 : vector<8x128xi1>, vector<8x128xf32>
    %cst_21 = arith.constant 1.000000e+01 : f32
    %39 = vector.broadcast %cst_21 : f32 to vector<8x128xf32>
    %40 = arith.cmpf oeq, %0, %39 : vector<8x128xf32>
    %cst_22 = arith.constant -3.64011788 : f32
    %41 = vector.broadcast %cst_22 : f32 to vector<8x128xf32>
    %42 = arith.select %40, %41, %38 : vector<8x128xi1>, vector<8x128xf32>
    %cst_23 = arith.constant 1.100000e+01 : f32
    %43 = vector.broadcast %cst_23 : f32 to vector<8x128xf32>
    %44 = arith.cmpf oeq, %0, %43 : vector<8x128xf32>
    %cst_24 = arith.constant -4.7570796 : f32
    %45 = vector.broadcast %cst_24 : f32 to vector<8x128xf32>
    %46 = arith.select %44, %45, %42 : vector<8x128xi1>, vector<8x128xf32>
    %cst_25 = arith.constant 1.200000e+01 : f32
    %47 = vector.broadcast %cst_25 : f32 to vector<8x128xf32>
    %48 = arith.cmpf oeq, %0, %47 : vector<8x128xf32>
    %cst_26 = arith.constant -6.14337397 : f32
    %49 = vector.broadcast %cst_26 : f32 to vector<8x128xf32>
    %50 = arith.select %48, %49, %46 : vector<8x128xi1>, vector<8x128xf32>
    %cst_27 = arith.constant 1.300000e+01 : f32
    %51 = vector.broadcast %cst_27 : f32 to vector<8x128xf32>
    %52 = arith.cmpf oeq, %0, %51 : vector<8x128xf32>
    %cst_28 = arith.constant -7.83285427 : f32
    %53 = vector.broadcast %cst_28 : f32 to vector<8x128xf32>
    %54 = arith.select %52, %53, %50 : vector<8x128xi1>, vector<8x128xf32>
    %cst_29 = arith.constant 1.400000e+01 : f32
    %55 = vector.broadcast %cst_29 : f32 to vector<8x128xf32>
    %56 = arith.cmpf oeq, %0, %55 : vector<8x128xf32>
    %cst_30 = arith.constant -9.88412475 : f32
    %57 = vector.broadcast %cst_30 : f32 to vector<8x128xf32>
    %58 = arith.select %56, %57, %54 : vector<8x128xi1>, vector<8x128xf32>
    %cst_31 = arith.constant 1.500000e+01 : f32
    %59 = vector.broadcast %cst_31 : f32 to vector<8x128xf32>
    %60 = arith.cmpf oeq, %0, %59 : vector<8x128xf32>
    %cst_32 = arith.constant -12.4098539 : f32
    %61 = vector.broadcast %cst_32 : f32 to vector<8x128xf32>
    %62 = arith.select %60, %61, %58 : vector<8x128xi1>, vector<8x128xf32>
    %cst_33 = arith.constant 1.600000e+01 : f32
    %63 = vector.broadcast %cst_33 : f32 to vector<8x128xf32>
    %64 = arith.cmpf oeq, %0, %63 : vector<8x128xf32>
    %cst_34 = arith.constant -15.6932678 : f32
    %65 = vector.broadcast %cst_34 : f32 to vector<8x128xf32>
    %66 = arith.select %64, %65, %62 : vector<8x128xi1>, vector<8x128xf32>
    %cst_35 = arith.constant -15.6932678 : f32
    %67 = vector.broadcast %cst_35 : f32 to vector<8x128xf32>
    %cst_36 = arith.constant 1.000000e+00 : f32
    %68 = vector.broadcast %cst_36 : f32 to vector<8x128xf32>
    %69 = arith.cmpf oeq, %1, %68 : vector<8x128xf32>
    %cst_37 = arith.constant -12.4098539 : f32
    %70 = vector.broadcast %cst_37 : f32 to vector<8x128xf32>
    %71 = arith.select %69, %70, %67 : vector<8x128xi1>, vector<8x128xf32>
    %cst_38 = arith.constant 2.000000e+00 : f32
    %72 = vector.broadcast %cst_38 : f32 to vector<8x128xf32>
    %73 = arith.cmpf oeq, %1, %72 : vector<8x128xf32>
    %cst_39 = arith.constant -9.88412475 : f32
    %74 = vector.broadcast %cst_39 : f32 to vector<8x128xf32>
    %75 = arith.select %73, %74, %71 : vector<8x128xi1>, vector<8x128xf32>
    %cst_40 = arith.constant 3.000000e+00 : f32
    %76 = vector.broadcast %cst_40 : f32 to vector<8x128xf32>
    %77 = arith.cmpf oeq, %1, %76 : vector<8x128xf32>
    %cst_41 = arith.constant -7.83285427 : f32
    %78 = vector.broadcast %cst_41 : f32 to vector<8x128xf32>
    %79 = arith.select %77, %78, %75 : vector<8x128xi1>, vector<8x128xf32>
    %cst_42 = arith.constant 4.000000e+00 : f32
    %80 = vector.broadcast %cst_42 : f32 to vector<8x128xf32>
    %81 = arith.cmpf oeq, %1, %80 : vector<8x128xf32>
    %cst_43 = arith.constant -6.14337397 : f32
    %82 = vector.broadcast %cst_43 : f32 to vector<8x128xf32>
    %83 = arith.select %81, %82, %79 : vector<8x128xi1>, vector<8x128xf32>
    %cst_44 = arith.constant 5.000000e+00 : f32
    %84 = vector.broadcast %cst_44 : f32 to vector<8x128xf32>
    %85 = arith.cmpf oeq, %1, %84 : vector<8x128xf32>
    %cst_45 = arith.constant -4.7570796 : f32
    %86 = vector.broadcast %cst_45 : f32 to vector<8x128xf32>
    %87 = arith.select %85, %86, %83 : vector<8x128xi1>, vector<8x128xf32>
    %cst_46 = arith.constant 6.000000e+00 : f32
    %88 = vector.broadcast %cst_46 : f32 to vector<8x128xf32>
    %89 = arith.cmpf oeq, %1, %88 : vector<8x128xf32>
    %cst_47 = arith.constant -3.64011788 : f32
    %90 = vector.broadcast %cst_47 : f32 to vector<8x128xf32>
    %91 = arith.select %89, %90, %87 : vector<8x128xi1>, vector<8x128xf32>
    %cst_48 = arith.constant 7.000000e+00 : f32
    %92 = vector.broadcast %cst_48 : f32 to vector<8x128xf32>
    %93 = arith.cmpf oeq, %1, %92 : vector<8x128xf32>
    %cst_49 = arith.constant -2.77261734 : f32
    %94 = vector.broadcast %cst_49 : f32 to vector<8x128xf32>
    %95 = arith.select %93, %94, %91 : vector<8x128xi1>, vector<8x128xf32>
    %cst_50 = arith.constant 8.000000e+00 : f32
    %96 = vector.broadcast %cst_50 : f32 to vector<8x128xf32>
    %97 = arith.cmpf oeq, %1, %96 : vector<8x128xf32>
    %cst_51 = arith.constant -2.14400887 : f32
    %98 = vector.broadcast %cst_51 : f32 to vector<8x128xf32>
    %99 = arith.select %97, %98, %95 : vector<8x128xi1>, vector<8x128xf32>
    %cst_52 = arith.constant 9.000000e+00 : f32
    %100 = vector.broadcast %cst_52 : f32 to vector<8x128xf32>
    %101 = arith.cmpf oeq, %1, %100 : vector<8x128xf32>
    %cst_53 = arith.constant -1.75096619 : f32
    %102 = vector.broadcast %cst_53 : f32 to vector<8x128xf32>
    %103 = arith.select %101, %102, %99 : vector<8x128xi1>, vector<8x128xf32>
    %cst_54 = arith.constant 1.000000e+01 : f32
    %104 = vector.broadcast %cst_54 : f32 to vector<8x128xf32>
    %105 = arith.cmpf oeq, %1, %104 : vector<8x128xf32>
    %cst_55 = arith.constant -1.59681547 : f32
    %106 = vector.broadcast %cst_55 : f32 to vector<8x128xf32>
    %107 = arith.select %105, %106, %103 : vector<8x128xi1>, vector<8x128xf32>
    %cst_56 = arith.constant 1.100000e+01 : f32
    %108 = vector.broadcast %cst_56 : f32 to vector<8x128xf32>
    %109 = arith.cmpf oeq, %1, %108 : vector<8x128xf32>
    %cst_57 = arith.constant -1.69212568 : f32
    %110 = vector.broadcast %cst_57 : f32 to vector<8x128xf32>
    %111 = arith.select %109, %110, %107 : vector<8x128xi1>, vector<8x128xf32>
    %cst_58 = arith.constant 1.200000e+01 : f32
    %112 = vector.broadcast %cst_58 : f32 to vector<8x128xf32>
    %113 = arith.cmpf oeq, %1, %112 : vector<8x128xf32>
    %cst_59 = arith.constant -2.05676889 : f32
    %114 = vector.broadcast %cst_59 : f32 to vector<8x128xf32>
    %115 = arith.select %113, %114, %111 : vector<8x128xi1>, vector<8x128xf32>
    %cst_60 = arith.constant 1.300000e+01 : f32
    %116 = vector.broadcast %cst_60 : f32 to vector<8x128xf32>
    %117 = arith.cmpf oeq, %1, %116 : vector<8x128xf32>
    %cst_61 = arith.constant -2.72459817 : f32
    %118 = vector.broadcast %cst_61 : f32 to vector<8x128xf32>
    %119 = arith.select %117, %118, %115 : vector<8x128xi1>, vector<8x128xf32>
    %cst_62 = arith.constant 1.400000e+01 : f32
    %120 = vector.broadcast %cst_62 : f32 to vector<8x128xf32>
    %121 = arith.cmpf oeq, %1, %120 : vector<8x128xf32>
    %cst_63 = arith.constant -3.75421762 : f32
    %122 = vector.broadcast %cst_63 : f32 to vector<8x128xf32>
    %123 = arith.select %121, %122, %119 : vector<8x128xi1>, vector<8x128xf32>
    %cst_64 = arith.constant 1.500000e+01 : f32
    %124 = vector.broadcast %cst_64 : f32 to vector<8x128xf32>
    %125 = arith.cmpf oeq, %1, %124 : vector<8x128xf32>
    %cst_65 = arith.constant -5.25829506 : f32
    %126 = vector.broadcast %cst_65 : f32 to vector<8x128xf32>
    %127 = arith.select %125, %126, %123 : vector<8x128xi1>, vector<8x128xf32>
    %cst_66 = arith.constant 1.600000e+01 : f32
    %128 = vector.broadcast %cst_66 : f32 to vector<8x128xf32>
    %129 = arith.cmpf oeq, %1, %128 : vector<8x128xf32>
    %cst_67 = arith.constant -7.52005816 : f32
    %130 = vector.broadcast %cst_67 : f32 to vector<8x128xf32>
    %131 = arith.select %129, %130, %127 : vector<8x128xi1>, vector<8x128xf32>
    %132 = arith.addf %66, %131 : vector<8x128xf32>
    %c0_68 = arith.constant 0 : index
    %c0_69 = arith.constant 0 : index
    %133 = vector.load %arg3[%c0_68, %c0_69] : memref<8x128xf32, #tpu.memory_space<vmem>>, vector<8x128xf32>
    tpu.vector_store %arg3[%c0_68, %c0_69], %132 {strides = array<i32>} : memref<8x128xf32, #tpu.memory_space<vmem>>, vector<8x128xf32>,
    return
  }
  func.func @transform_0(%arg0: i32) -> (i32, i32) {
    %c0_i32 = arith.constant 0 : i32
    %c0_i32_0 = arith.constant 0 : i32
    return %arg0, %c0_i32 : i32, i32
  }
  func.func @transform_1(%arg0: i32) -> (i32, i32) {
    %c0_i32 = arith.constant 0 : i32
    %c0_i32_0 = arith.constant 0 : i32
    return %arg0, %c0_i32 : i32, i32
  }
  func.func @transform_2(%arg0: i32) -> (i32, i32) {
    %c0_i32 = arith.constant 0 : i32
    %c0_i32_0 = arith.constant 0 : i32
    return %arg0, %c0_i32 : i32, i32
  }
}

</mosaic_0001>

<bundles_post_ra>
// kernel: simple_bin_forward.1
= control target key start
LH: loop header
LB: loop body
LE: loop exit
PB: predicated region body
PF: predicated region fallthrough
CT: control target
= control target key end

     0   :  { %v85_v1 = vmov -7.520058   ;;  %v86_v9 = vmov -15.693268   ;;  %s129_s0 = inlined_call_operand.vmem [shape: f32[8,128], index: 0, kind: input, shape index: {}]   ;;  %s130_s1 = inlined_call_operand.vmem [shape: f32[8,128], index: 1, kind: input, shape index: {}]   ;;  %s131_s2 = inlined_call_operand.vmem [shape: f32[8,128], index: 2, kind: output, shape index: {}]  }
   0x1   :  { %v105_v0 = vld [vmem:[%s129_s0] sm:$0xff] }
   0x2   :  { %vm13_vm0 = vcmp.eq.f32.partialorder %v105_v0, 1.0  ;;  %vm15_vm1 = vcmp.eq.f32.partialorder %v105_v0, 2.0  ;;  %vm17_vm2 = vcmp.eq.f32.partialorder %v105_v0, 3.0  ;;  %vm19_vm3 = vcmp.eq.f32.partialorder %v105_v0, 4.0  ;;  %v12_v3 = vld [vmem:[%s130_s1] sm:$0xff] }
   0x3   :  { %v14_v2 = vsel %vm13_vm0, -5.258295, %v85_v1  ;;  %vm21_vm4 = vcmp.eq.f32.partialorder %v105_v0, 5.0  ;;  %vm23_vm5 = vcmp.eq.f32.partialorder %v105_v0, 6.0  ;;  %vm25_vm6 = vcmp.eq.f32.partialorder %v105_v0, 7.0 }
   0x4   :  { %v16_v4 = vsel %vm15_vm1, -3.7542176, %v14_v2  ;;  %vm27_vm7 = vcmp.eq.f32.partialorder %v105_v0, 8.0  ;;  %vm45_vm8 = vcmp.eq.f32.partialorder %v12_v3, 1.0  ;;  %vm47_vm9 = vcmp.eq.f32.partialorder %v12_v3, 2.0 }
   0x5   :  { %v18_v5 = vsel %vm17_vm2, -2.7245982, %v16_v4  ;;  %vm49_vm10 = vcmp.eq.f32.partialorder %v12_v3, 3.0  ;;  %vm29_vm11 = vcmp.eq.f32.partialorder %v105_v0, 9.0  ;;  %v46_v10 = vsel %vm45_vm8, -12.409854, %v86_v9 }
   0x6   :  { %v20_v6 = vsel %vm19_vm3, -2.056769, %v18_v5  ;;  %vm51_vm12 = vcmp.eq.f32.partialorder %v12_v3, 4.0  ;;  %vm31_vm13 = vcmp.eq.f32.partialorder %v105_v0, 10.0  ;;  %v48_v12 = vsel %vm47_vm9, -9.884125, %v46_v10 }
   0x7   :  { %v22_v7 = vsel %vm21_vm4, -1.6921257, %v20_v6  ;;  %vm53_vm14 = vcmp.eq.f32.partialorder %v12_v3, 5.0  ;;  %vm33_vm15 = vcmp.eq.f32.partialorder %v105_v0, 11.0  ;;  %v50_v14 = vsel %vm49_vm10, -7.8328543, %v48_v12 }
   0x8   :  { %v24_v8 = vsel %vm23_vm5, -1.5968155, %v22_v7  ;;  %vm55_vm0 = vcmp.eq.f32.partialorder %v12_v3, 6.0  ;;  %vm35_vm1 = vcmp.eq.f32.partialorder %v105_v0, 12.0  ;;  %v52_v16 = vsel %vm51_vm12, -6.143374, %v50_v14 }
   0x9   :  { %v26_v11 = vsel %vm25_vm6, -1.7509662, %v24_v8  ;;  %vm57_vm2 = vcmp.eq.f32.partialorder %v12_v3, 7.0  ;;  %vm37_vm3 = vcmp.eq.f32.partialorder %v105_v0, 13.0  ;;  %v54_v18 = vsel %vm53_vm14, -4.7570796, %v52_v16 }
   0xa   :  { %v28_v13 = vsel %vm27_vm7, -2.1440089, %v26_v11  ;;  %vm59_vm4 = vcmp.eq.f32.partialorder %v12_v3, 8.0  ;;  %vm39_vm5 = vcmp.eq.f32.partialorder %v105_v0, 14.0  ;;  %v56_v20 = vsel %vm55_vm0, -3.640118, %v54_v18 }
   0xb   :  { %v30_v15 = vsel %vm29_vm11, -2.7726173, %v28_v13  ;;  %vm61_vm6 = vcmp.eq.f32.partialorder %v12_v3, 9.0  ;;  %v58_v22 = vsel %vm57_vm2, -2.7726173, %v56_v20  ;;  %vm63_vm7 = vcmp.eq.f32.partialorder %v12_v3, 10.0 }
   0xc   :  { %v32_v17 = vsel %vm31_vm13, -3.640118, %v30_v15  ;;  %vm41_vm8 = vcmp.eq.f32.partialorder %v105_v0, 15.0  ;;  %v60_v24 = vsel %vm59_vm4, -2.1440089, %v58_v22  ;;  %vm65_vm9 = vcmp.eq.f32.partialorder %v12_v3, 11.0 }
   0xd   :  { %v34_v19 = vsel %vm33_vm15, -4.7570796, %v32_v17  ;;  %v62_v26 = vsel %vm61_vm6, -1.7509662, %v60_v24  ;;  %vm67_vm10 = vcmp.eq.f32.partialorder %v12_v3, 12.0  ;;  %vm69_vm11 = vcmp.eq.f32.partialorder %v12_v3, 13.0 }
   0xe   :  { %v36_v21 = vsel %vm35_vm1, -6.143374, %v34_v19  ;;  %v64_v27 = vsel %vm63_vm7, -1.5968155, %v62_v26  ;;  %vm43_vm12 = vcmp.eq.f32.partialorder %v105_v0, 16.0  ;;  %vm71_vm13 = vcmp.eq.f32.partialorder %v12_v3, 14.0 }
   0xf   :  { %v38_v23 = vsel %vm37_vm3, -7.8328543, %v36_v21  ;;  %v66_v29 = vsel %vm65_vm9, -1.6921257, %v64_v27  ;;  %vm73_vm14 = vcmp.eq.f32.partialorder %v12_v3, 15.0  ;;  %vm75_vm15 = vcmp.eq.f32.partialorder %v12_v3, 16.0 }
  0x10   :  { %v40_v25 = vsel %vm39_vm5, -9.884125, %v38_v23  ;;  %v68_v30 = vsel %vm67_vm10, -2.056769, %v66_v29 }
  0x11   :  { %v42_v28 = vsel %vm41_vm8, -12.409854, %v40_v25  ;;  %v70_v31 = vsel %vm69_vm11, -2.7245982, %v68_v30 }
  0x12   :  { %v44_v32 = vsel %vm43_vm12, -15.693268, %v42_v28  ;;  %v72_v33 = vsel %vm71_vm13, -3.7542176, %v70_v31 }
  0x13   :  { %v74_v34 = vsel %vm73_vm14, -5.258295, %v72_v33 }
  0x14   :  { %v76_v35 = vsel %vm75_vm15, -7.520058, %v74_v34 }
  0x15   :  { %v77_v36 = vadd.f32 %v76_v35, %v44_v32 }
  0x17   :  { %78 = vst [vmem:[%s131_s2] sm:$0xff] %v77_v36 }

</bundles_post_ra>
